<compile_context>
chip_gen: v7x
topology: tpu7x:2x2x1
jax: 0.10.0
libtpu: 0.0.40
codegen_flags: <defaults>
</compile_context>

<pallas_src>
import functools

import jax
import jax.numpy as jnp
from jax.experimental import pallas as pl
from jax.experimental.pallas import tpu as pltpu


def _meta_model_kernel(x_ref, w_ref, b_ref, o_ref):
    # x: (tb, K) f32  -> cast to bf16 on the VPU (free slot, hidden under DMA)
    # w: (K, N) bf16  -> MXU-native orientation, contracted on K (sublane axis)
    # b: (1, N) f32
    x_bf = x_ref[...].astype(jnp.bfloat16)
    acc = jax.lax.dot_general(
        x_bf, w_ref[...],
        dimension_numbers=(((1,), (0,)), ((), ())),
        preferred_element_type=jnp.float32,
    )
    o_ref[...] = (acc + b_ref[...]).astype(o_ref.dtype)


def prepare_meta_model_params(weight, bias):
    """One-time parameter prep (do this at load time, NOT per forward call).

    weight: (output_dim, K) f32  (PyTorch nn.Linear layout)
    bias:   (output_dim,)   f32
    returns (w_kn, b2): ((K, N) bf16, (1, N) f32)
    """
    w_kn = jnp.asarray(weight).T.astype(jnp.bfloat16)          # (K, N), MXU-native
    b2 = jnp.asarray(bias).reshape(1, -1).astype(jnp.float32)  # (1, N)
    return w_kn, b2


@functools.partial(jax.jit, static_argnames=("block_b", "out_dtype"))
def meta_model_forward(features, w_kn, b2, *, block_b=512, out_dtype=jnp.float32):
    """features: (B, num_models, input_dim) f32
       w_kn:     (K, N) bf16   pre-transposed weight from prepare_meta_model_params
       b2:       (1, N) f32
       returns:  (B, N) out_dtype (default f32; pass bf16 if the consumer tolerates it)
    """
    B = features.shape[0]
    x = features.reshape(B, -1)            # (B, K) glue reshape, f32 stays f32
    K, N = w_kn.shape

    cost = pl.CostEstimate(
        flops=2 * B * K * N,
        transcendentals=0,
        bytes_accessed=B * K * 4 + K * N * 2 + N * 4 + B * N * jnp.dtype(out_dtype).itemsize,
    )
    out_shape = jax.ShapeDtypeStruct((B, N), out_dtype)

    if B <= block_b:
        # Gridless whole-block call: all operands resident in VMEM, one fused
        # matmul + bias add.  Explicit VMEM specs keep the layout deterministic and
        # identical to the tiled path.
        return pl.pallas_call(
            _meta_model_kernel,
            out_shape=out_shape,
            in_specs=[
                pl.BlockSpec(memory_space=pltpu.MemorySpace.VMEM),
                pl.BlockSpec(memory_space=pltpu.MemorySpace.VMEM),
                pl.BlockSpec(memory_space=pltpu.MemorySpace.VMEM),
            ],
            out_specs=pl.BlockSpec(memory_space=pltpu.MemorySpace.VMEM),
            cost_estimate=cost,
        )(x, w_kn, b2)

    # Large-batch path: tile B (cdiv grid handles ragged B; Pallas masks the partial
    # last block — garbage rows only appear on the non-contracted B axis and are never
    # written back).  The "parallel" axis lets a v7x chip's two TensorCores split the
    # rows; weight/bias blocks are grid-invariant so they are fetched once.
    tb = block_b
    grid_b = pl.cdiv(B, tb)
    return pl.pallas_call(
        _meta_model_kernel,
        out_shape=out_shape,
        grid=(grid_b,),
        in_specs=[
            pl.BlockSpec((tb, K), lambda i: (i, 0)),
            pl.BlockSpec((K, N), lambda i: (0, 0)),
            pl.BlockSpec((1, N), lambda i: (0, 0)),
        ],
        out_specs=pl.BlockSpec((tb, N), lambda i: (i, 0)),
        compiler_params=pltpu.CompilerParams(
            dimension_semantics=("parallel",),
        ),
        cost_estimate=cost,
    )(x, w_kn, b2)


if __name__ == "__main__":
    # Small shapes consistent with the module: num_models=5, input_dim=128,
    # output_dim=128, batch=8  (flattened K = 640).
    B, num_models, input_dim, output_dim = 8, 5, 128, 128
    K = num_models * input_dim

    key = jax.random.PRNGKey(0)
    k_feat, k_w, k_b = jax.random.split(key, 3)

    features = jax.random.normal(k_feat, (B, num_models, input_dim), dtype=jnp.float32)

    # Deterministic nn.Linear-style init: U(-1/sqrt(K), 1/sqrt(K))
    bound = 1.0 / (K ** 0.5)
    weight = jax.random.uniform(k_w, (output_dim, K), minval=-bound, maxval=bound,
                                dtype=jnp.float32)
    bias = jax.random.uniform(k_b, (output_dim,), minval=-bound, maxval=bound,
                              dtype=jnp.float32)

    # One-time parameter prep (hoisted out of the forward path).
    w_kn, b2 = prepare_meta_model_params(weight, bias)

    out = jax.block_until_ready(meta_model_forward(features, w_kn, b2))
    assert out.shape == (B, output_dim)

    # Tight check against the same bf16-weight / bf16-activation / f32-accumulate math.
    xf = features.reshape(B, -1).astype(jnp.bfloat16).astype(jnp.float32)
    wf = weight.astype(jnp.bfloat16).astype(jnp.float32)
    ref_bf = xf @ wf.T + bias
    assert jnp.allclose(out, ref_bf, atol=1e-4, rtol=1e-4)

    # Looser check against the full-f32 torch.nn.Linear forward semantics.
    ref_f32 = features.reshape(B, -1) @ weight.T + bias
    assert jnp.allclose(out, ref_f32, atol=2e-2, rtol=2e-2)

    # Also exercise the tiled "parallel B" path, including a ragged B (cdiv grid,
    # partial last block): B2=600 with tb=512 -> 2 grid steps, last block masked.
    B2 = 600
    feats2 = jax.random.normal(jax.random.PRNGKey(1), (B2, num_models, input_dim),
                               dtype=jnp.float32)
    out2 = jax.block_until_ready(meta_model_forward(feats2, w_kn, b2, block_b=512))
    ref2 = (feats2.reshape(B2, -1).astype(jnp.bfloat16).astype(jnp.float32) @ wf.T
            + bias)
    assert out2.shape == (B2, output_dim)
    assert jnp.allclose(out2, ref2, atol=1e-4, rtol=1e-4)

    print("KERNEL_OK")
</pallas_src>

<mosaic_0001>
module attributes {stable_mosaic.version = 11 : i64} {
  func.func @_meta_model_kernel(%arg0: memref<8x640xf32, #tpu.memory_space<vmem>>, %arg1: memref<640x128xbf16, #tpu.memory_space<vmem>>, %arg2: memref<1x128xf32, #tpu.memory_space<vmem>>, %arg3: memref<8x128xf32, #tpu.memory_space<vmem>>) attributes {dimension_semantics = [], scalar_prefetch = 0 : i64, scratch_operands = 0 : i64, tpu.core_type = #tpu.core_type<tc>} {
    %c0 = arith.constant 0 : index
    %c0_0 = arith.constant 0 : index
    %0 = vector.load %arg0[%c0, %c0_0] : memref<8x640xf32, #tpu.memory_space<vmem>>, vector<8x640xf32>
    %1 = arith.truncf %0 : vector<8x640xf32> to vector<8x640xbf16>
    %c0_1 = arith.constant 0 : index
    %c0_2 = arith.constant 0 : index
    %2 = vector.load %arg1[%c0_1, %c0_2] : memref<640x128xbf16, #tpu.memory_space<vmem>>, vector<640x128xbf16>
    %cst = arith.constant dense<0.000000e+00> : vector<8x128xf32>
    %3 = tpu.matmul %1, %2, %cst {dimension_numbers = #tpu.dot_dimension_numbers<[1], [0], [0], [1], [0, 0, 1, 1], [], []>} : vector<8x640xbf16>, vector<640x128xbf16>, vector<8x128xf32> -> vector<8x128xf32>
    %c0_3 = arith.constant 0 : index
    %c0_4 = arith.constant 0 : index
    %4 = vector.load %arg2[%c0_3, %c0_4] : memref<1x128xf32, #tpu.memory_space<vmem>>, vector<1x128xf32>
    %5 = vector.broadcast %4 : vector<1x128xf32> to vector<8x128xf32>
    %6 = arith.addf %3, %5 : vector<8x128xf32>
    %c0_5 = arith.constant 0 : index
    %c0_6 = arith.constant 0 : index
    %7 = vector.load %arg3[%c0_5, %c0_6] : memref<8x128xf32, #tpu.memory_space<vmem>>, vector<8x128xf32>
    tpu.vector_store %arg3[%c0_5, %c0_6], %6 {strides = array<i32>} : memref<8x128xf32, #tpu.memory_space<vmem>>, vector<8x128xf32>,
    return
  }
}

</mosaic_0001>

<bundles_post_ra>
// kernel: meta_model_forward.1
= control target key start
LH: loop header
LB: loop body
LE: loop exit
PB: predicated region body
PF: predicated region fallthrough
CT: control target
= control target key end

     0   :  { %8 = vsyncpa [#allocation3], 0  ;;  %s822_s0 = inlined_call_operand.hbm [shape: f32[8,640], index: 0, kind: input, shape index: {}]   ;;  %s823_s1 = inlined_call_operand.hbm [shape: bf16[640,128], index: 1, kind: input, shape index: {}]   ;;  %s824_s2 = inlined_call_operand.vmem [shape: f32[1,128], index: 2, kind: input, shape index: {}]   ;;  %s825_s3 = inlined_call_operand.hbm [shape: f32[8,128], index: 3, kind: output, shape index: {}]  }
   0x1   :  { %9 = vsyncpa [#allocation6], 0 }
   0x2   :  { %10 = vsyncpa [#allocation4], 0  ;;  %s749_s12 = smov [#allocation2]   ;;  %s750_s14 = smov [#allocation5]  }
   0x3   :  { %s17_s13 = sshll.u32 %s749_s12, 4  ;;  %s26_s15 = sshll.u32 %s750_s14, 4  ;;  %s18_s13 = int_to_ptr.vmem [resolvable:$true] %s17_s13  ;;  %s776_s15 = int_to_ptr.vmem [resolvable:$true] %s26_s15 }
   0x4   :  { %s677_s18 = scalar_lea.hbm %s822_s0, 640 }
   0x5   :  { %p678_p0 = scmp.ne.s32.totalorder %s822_s0, %s677_s18  ;;  %p681_p1 = scmp.lt.u32.totalorder %s677_s18, %s822_s0 }
   0x7   :  { %p683_p2 = pnand %p681_p1, %p678_p0 }
   0x9   :  { %686 = shalt.err (!%p683_p2)
}
   0xa   :  { %s687_s23 = scalar_lea.vmem %s18_s13, 640  ;;  %p692_p4 = scmp.lt.s32.totalorder %s18_s13, %s18_s13 }
   0xb   :  { %p688_p3 = scmp.ne.s32.totalorder %s18_s13, %s687_s23  ;;  %p693_p5 = scmp.lt.s32.totalorder %s687_s23, %s687_s23 }
   0xd   :  { %p694_p6 = por %p693_p5, %p692_p4 }
   0xf   :  { %p695_p7 = pnand %p694_p6, %p688_p3 }
  0x11   :  { %698 = shalt.err (!%p695_p7)
}
  0x12   :  { %20 = dma.hbm_to_vmem [thread:$0]  %s822_s0, 640, %s18_s13, [#allocation3]  }
  0x13   :  { %s699_s28 = scalar_lea.hbm %s823_s1, 5120 }
  0x14   :  { %p700_p8 = scmp.ne.s32.totalorder %s823_s1, %s699_s28  ;;  %p703_p9 = scmp.lt.u32.totalorder %s699_s28, %s823_s1 }
  0x16   :  { %p705_p10 = pnand %p703_p9, %p700_p8 }
  0x18   :  { %708 = shalt.err (!%p705_p10)
}
  0x19   :  { %s709_s6 = scalar_lea.vmem %s776_s15, 5120  ;;  %p714_p12 = scmp.lt.s32.totalorder %s776_s15, %s776_s15 }
  0x1a   :  { %p710_p11 = scmp.ne.s32.totalorder %s776_s15, %s709_s6  ;;  %p715_p13 = scmp.lt.s32.totalorder %s709_s6, %s709_s6 }
  0x1c   :  { %p716_p0 = por %p715_p13, %p714_p12 }
  0x1e   :  { %p717_p1 = pnand %p716_p0, %p710_p11 }
  0x20   :  { %720 = shalt.err (!%p717_p1)
}
  0x21   :  { %s751_s0 = smov 64   ;;  %s752_s7 = smov 4  }
  0x22   :  { %32 = dma.hbm_to_vmem [thread:$0]  %s823_s1, 5120, %s776_s15, [#allocation6], %s751_s0, %s751_s0, %s752_s7  }
  0x23   :  { %743 = dma.done.wait [#allocation3], 640  }
  0x24   :  { %744 = vsyncadd [#allocation3], 4294966656 }
  0x25   :  { %745 = dma.done.wait [#allocation6], 5120  }
  0x26   :  { %746 = vsyncadd [#allocation6], 4294962176  ;;  %v637_v0 = vld [vmem:[#allocation5 + $0x40] sm:$0xff]   ;;  %v641_v4 = vld [vmem:[#allocation5 + $0x48] sm:$0xff]   ;;  %v753_v35 = vmov 0.0   ;;  %vm754_vm0 = vmmov 0  }
  0x27   :  { %v638_v1 = vld [vmem:[#allocation5] sm:$0xff]   ;;  %557 = vmatprep.subr.bf16.mxu0 %v637_v0  ;;  %v642_v5 = vld [vmem:[#allocation5 + $0x8] sm:$0xff]   ;;  %v645_v8 = vld [vmem:[#allocation5 + $0x50] sm:$0xff]   ;;  %s755_s11 = smov [#allocation7]  }
  0x28   :  { %v639_v2 = vld [vmem:[#allocation5 + $0xc0] sm:$0xff]   ;;  %558 = vmatpush3.bf16.msra.mxu0 %v638_v1  ;;  %v643_v6 = vld [vmem:[#allocation5 + $0xc8] sm:$0xff]   ;;  %v646_v9 = vld [vmem:[#allocation5 + $0x10] sm:$0xff]   ;;  %s506_s12 = sshll.u32 %s755_s11, 4  ;;  %s507_s12 = int_to_ptr.vmem [resolvable:$true] %s506_s12 }
  0x29   :  { %v640_v3 = vld [vmem:[#allocation5 + $0x80] sm:$0xff]   ;;  %579 = vmatprep.subr.bf16.mxu1 %v639_v2  ;;  %559 = vmatprep.subr.bf16.mxu0 %v641_v4  ;;  %v644_v7 = vld [vmem:[#allocation5 + $0x88] sm:$0xff]   ;;  %v647_v10 = vld [vmem:[#allocation5 + $0xd0] sm:$0xff]   ;;  %p726_p3 = scmp.lt.s32.totalorder %s507_s12, %s507_s12 }
  0x2a   :  { %580 = vmatpush3.bf16.msra.mxu1 %v640_v3  ;;  %v648_v11 = vld [vmem:[#allocation5 + $0x90] sm:$0xff]   ;;  %v649_v12 = vld [vmem:[#allocation5 + $0x58] sm:$0xff]   ;;  %v653_v16 = vld [vmem:[#allocation5 + $0x60] sm:$0xff]  }
  0x2b   :  { %581 = vmatprep.subr.bf16.mxu1 %v643_v6  ;;  %v650_v13 = vld [vmem:[#allocation5 + $0x18] sm:$0xff]   ;;  %v654_v17 = vld [vmem:[#allocation5 + $0x20] sm:$0xff]   ;;  %v657_v20 = vld [vmem:[#allocation5 + $0x68] sm:$0xff]  }
  0x2c   :  { %560 = vmatpush3.bf16.msra.mxu0 %v642_v5  ;;  %v651_v14 = vld [vmem:[#allocation5 + $0xd8] sm:$0xff]   ;;  %v655_v18 = vld [vmem:[#allocation5 + $0xe0] sm:$0xff]   ;;  %v658_v21 = vld [vmem:[#allocation5 + $0x28] sm:$0xff]  }
  0x2d   :  { %561 = vmatprep.subr.bf16.mxu0 %v645_v8  ;;  %v652_v15 = vld [vmem:[#allocation5 + $0x98] sm:$0xff]   ;;  %v656_v19 = vld [vmem:[#allocation5 + $0xa0] sm:$0xff]   ;;  %v659_v22 = vld [vmem:[#allocation5 + $0xe8] sm:$0xff]  }
  0x2e   :  { %582 = vmatpush3.bf16.msra.mxu1 %v644_v7  ;;  %v660_v23 = vld [vmem:[#allocation5 + $0xa8] sm:$0xff]   ;;  %v661_v24 = vld [vmem:[#allocation5 + $0x70] sm:$0xff]   ;;  %v665_v28 = vld [vmem:[#allocation5 + $0x78] sm:$0xff]  }
  0x2f   :  { %583 = vmatprep.subr.bf16.mxu1 %v647_v10  ;;  %v662_v25 = vld [vmem:[#allocation5 + $0x30] sm:$0xff]   ;;  %v666_v29 = vld [vmem:[#allocation5 + $0x38] sm:$0xff]   ;;  %v43_v31 = vld [vmem:[#allocation2 + $0x8] sm:$0xff] }
  0x30   :  { %562 = vmatpush3.bf16.msra.mxu0 %v646_v9  ;;  %v663_v26 = vld [vmem:[#allocation5 + $0xf0] sm:$0xff]   ;;  %v667_v30 = vld [vmem:[#allocation5 + $0xf8] sm:$0xff]   ;;  %v48_v32 = vpack.c.bf16 %v43_v31, %v43_v31  ;;  %v669_v39 = vld [vmem:[#allocation5 + $0x100] sm:$0xff]  }
  0x31   :  { %563 = vmatprep.subr.bf16.mxu0 %v649_v12  ;;  %v664_v27 = vld [vmem:[#allocation5 + $0xb0] sm:$0xff]   ;;  %v668_v33 = vld [vmem:[#allocation5 + $0xb8] sm:$0xff]   ;;  %v44_v40 = vld [vmem:[#allocation2 + $0x10] sm:$0xff] }
  0x32   :  { %584 = vmatpush3.bf16.msra.mxu1 %v648_v11  ;;  %v42_v34 = vld [vmem:[#allocation2] sm:$0xff]  ;;  %v45_v36 = vld [vmem:[#allocation2 + $0x18] sm:$0xff]  ;;  %411 = vmatprep.mubr.bf16.mxu0 %v48_v32  ;;  %v49_v41 = vpack.c.bf16 %v44_v40, %v44_v40  ;;  %v670_v42 = vld [vmem:[#allocation5 + $0x108] sm:$0xff]  }
  0x33   :  { %585 = vmatprep.subr.bf16.mxu1 %v651_v14  ;;  %v47_v37 = vpack.c.bf16 %v42_v34, %v42_v34  ;;  %v50_v38 = vpack.c.bf16 %v45_v36, %v45_v36  ;;  %v671_v43 = vld [vmem:[#allocation5 + $0x110] sm:$0xff]   ;;  %v672_v44 = vld [vmem:[#allocation5 + $0x118] sm:$0xff]   ;;  %v673_v45 = vld [vmem:[#allocation5 + $0x120] sm:$0xff]  }
  0x34   :  { %564 = vmatpush3.bf16.msra.mxu0 %v650_v13  ;;  %v674_v46 = vld [vmem:[#allocation5 + $0x128] sm:$0xff]   ;;  %v675_v47 = vld [vmem:[#allocation5 + $0x130] sm:$0xff]   ;;  %v676_v48 = vld [vmem:[#allocation5 + $0x138] sm:$0xff]  }
  0x35   :  { %565 = vmatprep.subr.bf16.mxu0 %v653_v16  ;;  %451 = vmatprep.mubr.bf16.mxu1 %v50_v38  ;;  %v46_v49 = vld [vmem:[#allocation2 + $0x20] sm:$0xff] }
  0x36   :  { %586 = vmatpush3.bf16.msra.mxu1 %v652_v15  ;;  %v51_v50 = vpack.c.bf16 %v46_v49, %v46_v49  ;;  %v516_v52 = vld [vmem:[%s824_s2] ss:$0 sm:$0xff]  ;;  %s721_s2 = scalar_lea.vmem %s507_s12, 128 }
  0x37   :  { %587 = vmatprep.subr.bf16.mxu1 %v655_v18  ;;  %p722_p2 = scmp.ne.s32.totalorder %s507_s12, %s721_s2  ;;  %p727_p4 = scmp.lt.s32.totalorder %s721_s2, %s721_s2 }
  0x38   :  { %566 = vmatpush3.bf16.msra.mxu0 %v654_v17 }
  0x39   :  { %567 = vmatprep.subr.bf16.mxu0 %v657_v20  ;;  %p728_p5 = por %p727_p4, %p726_p3 }
  0x3a   :  { %588 = vmatpush3.bf16.msra.mxu1 %v656_v19 }
  0x3b   :  { %589 = vmatprep.subr.bf16.mxu1 %v659_v22  ;;  %p729_p6 = pnand %p728_p5, %p722_p2 }
  0x3c   :  { %568 = vmatpush3.bf16.msra.mxu0 %v658_v21 }
  0x3d   :  { %569 = vmatprep.subr.bf16.mxu0 %v661_v24 }
  0x3e   :  { %590 = vmatpush3.bf16.msra.mxu1 %v660_v23 }
  0x3f   :  { %591 = vmatprep.subr.bf16.mxu1 %v663_v26 }
  0x40   :  { %570 = vmatpush3.bf16.msra.mxu0 %v662_v25 }
  0x41   :  { %571 = vmatprep.subr.bf16.mxu0 %v665_v28 }
  0x42   :  { %592 = vmatpush3.bf16.msra.mxu1 %v664_v27 }
  0x43   :  { %593 = vmatprep.subr.bf16.mxu1 %v667_v30 }
  0x44   :  { %572 = vmatpush3.bf16.msra.mxu0 %v666_v29 }
  0x45   :  { %610 = vmatprep.subr.bf16.mxu0 %v753_v35 }
  0x46   :  { %594 = vmatpush3.bf16.msra.mxu1 %v668_v33 }
  0x47   :  { %412 = vmatmul.mubr.bf16.vlgmr.msra.gmra.mrb[0].mxu0 %v47_v37 }
  0x48   :  { %611 = vmatpush3.bf16.msra.mxu0 %v669_v39  ;;  %626 = vmatprep.mubr.msk.bf16.mxu0 %vm754_vm0, %v753_v35 }
  0x49   :  { %452 = vmatmul.mubr.bf16.vlgmr.msra.gmra.mrb[0].mxu1 %v49_v41  ;;  %612 = vmatprep.subr.bf16.mxu0 %v753_v35 }
  0x4c   :  { %613 = vmatpush3.bf16.msra.mxu0 %v670_v42 }
  0x4d   :  { %614 = vmatprep.subr.bf16.mxu0 %v753_v35 }
  0x50   :  { %615 = vmatpush3.bf16.msra.mxu0 %v671_v43 }
  0x51   :  { %616 = vmatprep.subr.bf16.mxu0 %v753_v35 }
  0x54   :  { %617 = vmatpush3.bf16.msra.mxu0 %v672_v44 }
  0x55   :  { %618 = vmatprep.subr.bf16.mxu0 %v753_v35 }
  0x58   :  { %619 = vmatpush3.bf16.msra.mxu0 %v673_v45 }
  0x59   :  { %620 = vmatprep.subr.bf16.mxu0 %v753_v35 }
  0x5c   :  { %621 = vmatpush3.bf16.msra.mxu0 %v674_v46 }
  0x5d   :  { %622 = vmatprep.subr.bf16.mxu0 %v753_v35 }
  0x60   :  { %623 = vmatpush3.bf16.msra.mxu0 %v675_v47 }
  0x61   :  { %624 = vmatprep.subr.bf16.mxu0 %v753_v35 }
  0x64   :  { %625 = vmatpush3.bf16.msra.mxu0 %v676_v48 }
  0x67   :  { %627 = vmatmul.mubr.bf16.vlgmr.msra.gmra.mrb[4].mxu0 %v51_v50 }
 0x11a   :  { %v573_v51 = vpop.f32.mrb[0].mxu0 }
 0x11b   :  { %v574_v53 = vpop.f32.mrb[1].mxu0 }
 0x11c   :  { %v575_v54 = vadd.f32 %v574_v53, %v573_v51  ;;  %v576_v55 = vpop.f32.mrb[2].mxu0  ;;  %v595_v56 = vpop.f32.mrb[0].mxu1 }
 0x11d   :  { %v577_v57 = vpop.f32.mrb[3].mxu0  ;;  %v596_v58 = vpop.f32.mrb[1].mxu1 }
 0x11e   :  { %v414_v59 = vadd.f32 %v575_v54, %v516_v52  ;;  %v597_v60 = vadd.f32 %v596_v58, %v595_v56  ;;  %v598_v61 = vpop.f32.mrb[2].mxu1 }
 0x11f   :  { %v599_v62 = vpop.f32.mrb[3].mxu1 }
 0x120   :  { %v454_v63 = vadd.f32 %v597_v60, %v414_v59 }
 0x13a   :  { %v493_v0 = vpop.f32.mrb[4].mxu0 }
 0x13b   :  { %v494_v1 = vadd.f32 %v493_v0, %v454_v63  ;;  %v628_v2 = vpop.f32.mrb[5].mxu0 }
 0x13c   :  { %v496_v3 = vpop.f32.mrb[6].mxu0 }
 0x13d   :  { %499 = vst [vmem:[#allocation7] sm:$0xff] %v494_v1  ;;  %v629_v4 = vpop.f32.mrb[7].mxu0 }
 0x13e   :  { %732 = shalt.err (!%p729_p6)
}
 0x13f   :  { %s733_s15 = scalar_lea.hbm %s825_s3, 128 }
 0x140   :  { %p734_p7 = scmp.ne.s32.totalorder %s825_s3, %s733_s15  ;;  %p737_p8 = scmp.lt.u32.totalorder %s733_s15, %s825_s3 }
 0x142   :  { %p739_p9 = pnand %p737_p8, %p734_p7 }
 0x144   :  { %742 = shalt.err (!%p739_p9)
}
 0x145   :  { %509 = dma.vmem_to_hbm [thread:$0]  %s507_s12, 128, %s825_s3, [#allocation4]  }
 0x146   :  { %747 = dma.done.wait [#allocation4], 128  }
 0x147   :  { %748 = vsyncadd [#allocation4], 4294967168 }
 0x148   :  { %513 = vsyncpa [#allocation3], 1 }
 0x149   :  { %514 = vsyncpa [#allocation6], 1 }
 0x14a   :  { %515 = vsyncpa [#allocation4], 1 }

</bundles_post_ra>
